<compile_context>
chip_gen: v7x
topology: tpu7x:2x2x1
jax: 0.10.0
libtpu: 0.0.40
codegen_flags: <defaults>
</compile_context>

<pallas_src>
import jax
import jax.numpy as jnp
from jax.experimental import pallas as pl
from jax.experimental.pallas import tpu as pltpu


def head_kernel(x_ref, w1_ref, b1_ref, w2_ref, b2_ref, o_ref):
    # fc1 on the MXU; accumulate in f32 regardless of input dtype.
    h = jnp.dot(x_ref[...], w1_ref[...], preferred_element_type=jnp.float32)
    h = jnp.maximum(h + b1_ref[...], 0.0)  # bias + ReLU (VPU, f32)
    # drop1: eval-mode dropout == identity.
    # fc2 (out_features == 1): VPU multiply + lane reduction; b2 is an SMEM scalar.
    out = jnp.sum(h * w2_ref[...], axis=-1, keepdims=True) + b2_ref[0]
    o_ref[...] = out.astype(o_ref.dtype)


def _pick_tile_b(batch, in_dim, itemsize, vmem_budget_bytes=8 * 1024 * 1024):
    """Largest power-of-two batch tile (8 <= tb <= 2048) whose double-buffered
    x slab fits the VMEM budget; collapse to the full batch if it's smaller."""
    tb = 2048
    while tb > 8 and 2 * tb * in_dim * itemsize > vmem_budget_bytes:
        tb //= 2
    if batch <= tb:
        tb = batch  # single full-extent block (no divisibility constraint)
    return tb


def head_module_forward(x, w1, b1, w2, b2, *, tile_b=None, matmul_dtype=None):
    """HeadModule forward.

    Args:
      x:  (B, in_dim) activations.
      w1: (in_dim, 32)  == fc1.weight.T
      b1: (1, 32)       == fc1.bias[None, :]
      w2: (1, 32)       == fc2.weight (native PyTorch layout)
      b2: (1,)          == fc2.bias
      tile_b: optional batch-tile override (multiple of 8 if < B).
      matmul_dtype: optional dtype (e.g. jnp.bfloat16) for the fc1 MXU matmul
        inputs; halves HBM traffic for x on v6e/v7x. Accumulation stays f32.
    """
    B, in_dim = x.shape
    hidden = w1.shape[1]

    if matmul_dtype is not None:
        x = x.astype(matmul_dtype)
        w1 = w1.astype(matmul_dtype)

    if tile_b is None:
        tile_b = _pick_tile_b(B, in_dim, jnp.dtype(x.dtype).itemsize)
    tb = min(tile_b, B)
    grid = (pl.cdiv(B, tb),)

    return pl.pallas_call(
        head_kernel,
        out_shape=jax.ShapeDtypeStruct((B, 1), jnp.float32),
        grid=grid,
        in_specs=[
            pl.BlockSpec((tb, in_dim), lambda i: (i, 0)),       # x: streamed per tile
            pl.BlockSpec((in_dim, hidden), lambda i: (0, 0)),   # w1: resident
            pl.BlockSpec((1, hidden), lambda i: (0, 0)),        # b1: resident
            pl.BlockSpec((1, hidden), lambda i: (0, 0)),        # w2: resident
            pl.BlockSpec(memory_space=pltpu.MemorySpace.SMEM),  # b2: SMEM scalar
        ],
        out_specs=pl.BlockSpec((tb, 1), lambda i: (i, 0)),
        compiler_params=pltpu.CompilerParams(
            dimension_semantics=("parallel",)),
    )(x, w1, b1, w2, b2)


def reference_forward(x, w1, b1, w2, b2):
    h = jnp.maximum(x @ w1 + b1, 0.0)
    return h @ w2.T + b2  # w2 is (1, 32) native PyTorch layout; b2 is (1,)


if __name__ == "__main__":
    batch = 16
    in_dim = 64
    hidden = 32

    key = jax.random.PRNGKey(0)
    kx, kw1, kb1, kw2, kb2 = jax.random.split(key, 5)

    x = jax.random.normal(kx, (batch, in_dim), dtype=jnp.float32)
    # Deterministic synthetic parameters (PyTorch Linear shapes; w1 transposed).
    w1 = jax.random.normal(kw1, (in_dim, hidden), dtype=jnp.float32) * 0.05
    b1 = jax.random.normal(kb1, (1, hidden), dtype=jnp.float32) * 0.05
    w2 = jax.random.normal(kw2, (1, hidden), dtype=jnp.float32) * 0.05
    b2 = jax.random.normal(kb2, (1,), dtype=jnp.float32) * 0.05

    # f32 path; tile_b=8 -> 2 grid steps, exercising the batch-tiled pipeline.
    out = head_module_forward(x, w1, b1, w2, b2, tile_b=8)
    out = jax.block_until_ready(out)
    ref = reference_forward(x, w1, b1, w2, b2)
    assert out.shape == (batch, 1), out.shape
    assert jnp.allclose(out, ref, atol=1e-5, rtol=1e-5), "f32 mismatch vs reference"

    # bf16-fed MXU path (HBM/MXU win on v6e/v7x); accumulation stays f32.
    out_bf16 = head_module_forward(x, w1, b1, w2, b2, matmul_dtype=jnp.bfloat16)
    out_bf16 = jax.block_until_ready(out_bf16)
    ref_bf16 = reference_forward(
        x.astype(jnp.bfloat16).astype(jnp.float32),
        w1.astype(jnp.bfloat16).astype(jnp.float32),
        b1, w2, b2)
    assert out_bf16.shape == (batch, 1), out_bf16.shape
    assert jnp.allclose(out_bf16, ref_bf16, atol=1e-2, rtol=1e-2), "bf16 mismatch"

    print("KERNEL_OK")
</pallas_src>

<mosaic_0001>
module attributes {stable_mosaic.version = 11 : i64} {
  func.func @head_kernel(%arg0: i32, %arg1: memref<8x64xf32, #tpu.memory_space<vmem>>, %arg2: memref<64x32xf32, #tpu.memory_space<vmem>>, %arg3: memref<1x32xf32, #tpu.memory_space<vmem>>, %arg4: memref<1x32xf32, #tpu.memory_space<vmem>>, %arg5: memref<1xf32, #tpu.memory_space<smem>>, %arg6: memref<8x1xf32, #tpu.memory_space<vmem>>) attributes {dimension_semantics = [#tpu.dimension_semantics<parallel>], iteration_bounds = array<i64: 2>, scalar_prefetch = 0 : i64, scratch_operands = 0 : i64, tpu.core_type = #tpu.core_type<tc>, window_params = [{transform_indices = @transform_0, window_bounds = array<i64: 8, 64>}, {pipeline_mode = #tpu.pipeline_mode<synchronous>, transform_indices = @transform_1, window_bounds = array<i64: 64, 32>}, {pipeline_mode = #tpu.pipeline_mode<synchronous>, transform_indices = @transform_2, window_bounds = array<i64: 1, 32>}, {pipeline_mode = #tpu.pipeline_mode<synchronous>, transform_indices = @transform_3, window_bounds = array<i64: 1, 32>}, {transform_indices = @transform_4, window_bounds = array<i64: 1>}, {transform_indices = @transform_5, window_bounds = array<i64: 8, 1>}]} {
    %c0 = arith.constant 0 : index
    %c0_0 = arith.constant 0 : index
    %0 = vector.load %arg1[%c0, %c0_0] : memref<8x64xf32, #tpu.memory_space<vmem>>, vector<8x64xf32>
    %c0_1 = arith.constant 0 : index
    %c0_2 = arith.constant 0 : index
    %1 = vector.load %arg2[%c0_1, %c0_2] : memref<64x32xf32, #tpu.memory_space<vmem>>, vector<64x32xf32>
    %cst = arith.constant dense<0.000000e+00> : vector<8x32xf32>
    %2 = tpu.matmul %0, %1, %cst {dimension_numbers = #tpu.dot_dimension_numbers<[1], [0], [0], [1], [0, 0, 1, 1], [], []>} : vector<8x64xf32>, vector<64x32xf32>, vector<8x32xf32> -> vector<8x32xf32>
    %c0_3 = arith.constant 0 : index
    %c0_4 = arith.constant 0 : index
    %3 = vector.load %arg3[%c0_3, %c0_4] : memref<1x32xf32, #tpu.memory_space<vmem>>, vector<1x32xf32>
    %4 = vector.broadcast %3 : vector<1x32xf32> to vector<8x32xf32>
    %5 = arith.addf %2, %4 : vector<8x32xf32>
    %cst_5 = arith.constant 0.000000e+00 : f32
    %6 = vector.broadcast %cst_5 : f32 to vector<8x32xf32>
    %7 = arith.maximumf %5, %6 : vector<8x32xf32>
    %c0_6 = arith.constant 0 : index
    %c0_7 = arith.constant 0 : index
    %8 = vector.load %arg4[%c0_6, %c0_7] : memref<1x32xf32, #tpu.memory_space<vmem>>, vector<1x32xf32>
    %9 = vector.broadcast %8 : vector<1x32xf32> to vector<8x32xf32>
    %10 = arith.mulf %7, %9 : vector<8x32xf32>
    %cst_8 = arith.constant dense<0.000000e+00> : vector<8xf32>
    %11 = vector.multi_reduction <add>, %10, %cst_8 [1] : vector<8x32xf32> to vector<8xf32>
    %12 = vector.shape_cast %11 : vector<8xf32> to vector<8x1xf32>
    %c0_9 = arith.constant 0 : index
    %13 = memref.load %arg5[%c0_9] : memref<1xf32, #tpu.memory_space<smem>>
    %14 = vector.broadcast %13 : f32 to vector<8x1xf32>
    %15 = arith.addf %12, %14 : vector<8x1xf32>
    %c0_10 = arith.constant 0 : index
    %c0_11 = arith.constant 0 : index
    %16 = vector.load %arg6[%c0_10, %c0_11] : memref<8x1xf32, #tpu.memory_space<vmem>>, vector<8x1xf32>
    tpu.vector_store %arg6[%c0_10, %c0_11], %15 {strides = array<i32>} : memref<8x1xf32, #tpu.memory_space<vmem>>, vector<8x1xf32>,
    return
  }
  func.func @transform_0(%arg0: i32) -> (i32, i32) {
    %c0_i32 = arith.constant 0 : i32
    %c0_i32_0 = arith.constant 0 : i32
    return %arg0, %c0_i32 : i32, i32
  }
  func.func @transform_1(%arg0: i32) -> (i32, i32) {
    %c0_i32 = arith.constant 0 : i32
    %c0_i32_0 = arith.constant 0 : i32
    %c0_i32_1 = arith.constant 0 : i32
    return %c0_i32, %c0_i32_0 : i32, i32
  }
  func.func @transform_2(%arg0: i32) -> (i32, i32) {
    %c0_i32 = arith.constant 0 : i32
    %c0_i32_0 = arith.constant 0 : i32
    %c0_i32_1 = arith.constant 0 : i32
    return %c0_i32, %c0_i32_0 : i32, i32
  }
  func.func @transform_3(%arg0: i32) -> (i32, i32) {
    %c0_i32 = arith.constant 0 : i32
    %c0_i32_0 = arith.constant 0 : i32
    %c0_i32_1 = arith.constant 0 : i32
    return %c0_i32, %c0_i32_0 : i32, i32
  }
  func.func @transform_4(%arg0: i32) -> i32 {
    %c0_i32 = arith.constant 0 : i32
    %c0_i32_0 = arith.constant 0 : i32
    return %c0_i32 : i32
  }
  func.func @transform_5(%arg0: i32) -> (i32, i32) {
    %c0_i32 = arith.constant 0 : i32
    %c0_i32_0 = arith.constant 0 : i32
    return %arg0, %c0_i32 : i32, i32
  }
}

</mosaic_0001>

<bundles_post_ra>
// kernel: tpu_custom_call.1
= control target key start
LH: loop header
LB: loop body
LE: loop exit
PB: predicated region body
PF: predicated region fallthrough
CT: control target
= control target key end

     0   :  { %s489_s20 = smov 0   ;;  %s536_s0 = inlined_call_operand.vmem [shape: f32[16,64], index: 0, kind: input, shape index: {}]   ;;  %s537_s1 = inlined_call_operand.vmem [shape: f32[64,32], index: 1, kind: input, shape index: {}]   ;;  %s538_s2 = inlined_call_operand.vmem [shape: f32[1,32], index: 2, kind: input, shape index: {}]   ;;  %s539_s3 = inlined_call_operand.vmem [shape: f32[1,32], index: 3, kind: input, shape index: {}]   ;;  %s540_s4 = inlined_call_operand.<no memory space> [shape: f32[1], index: 4, kind: input, shape index: {}]   ;;  %s541_s5 = inlined_call_operand.vmem [shape: f32[16,1], index: 5, kind: output, shape index: {}]  }
   0x1   :  { %10 = sst [smem:[#allocation2]] %s540_s4 }
   0x2 LB: > { %s382_s21 = sadd.s32 4294967295, %s451_s20   ;;  %p386_p0 = scmp.ge.s32.totalorder %s451_s20, 1  ;;  %s451_s20 = sphi %s489_s20, %s16_s20  }
   0x3   : > { %p187_p1 = scmp.lt.s32.totalorder %s451_s20, 3 }
   0x5   : > { %p188_p2 = pnand %p386_p0, %p187_p1 }
   0x6   : > { %v222_v0 = vld [vmem:[%s537_s1] sm:$0xff] (!%p188_p2)  ;;  %v223_v1 = vld [vmem:[%s537_s1 + $0x8] sm:$0xff] (!%p188_p2)  ;;  %v224_v2 = vld [vmem:[%s537_s1 + $0x10] sm:$0xff] (!%p188_p2)  ;;  %v453_v3 = vmov (!%p188_p2), 0.0|0.0   ;;  %vm454_vm0 = vmmov (!%p188_p2), 0   ;;  %v455_v6 = vmov (!%p188_p2), 0.0  }
   0x7   : > { %191 = sbr.rel (%p188_p2) target bundleno = 388 (0x184), region = 40  ;;  %422 = vmatprep.subr.bf16.mxu0 (!%p188_p2), %v453_v3  ;;  %v423_v4 = vpack.c.bf16 (!%p188_p2), %v223_v1, %v222_v0  ;;  %v225_v5 = vld [vmem:[%s537_s1 + $0x18] sm:$0xff] (!%p188_p2)  ;;  %419 = vmatprep.mubr.msk.f32.mxu0 (!%p188_p2), %vm454_vm0, %v455_v6  ;;  %p213_p3 = scmp.lt.s32.totalorder (!%p188_p2), %s382_s21, 1  ;;  %v226_v8 = vld [vmem:[%s537_s1 + $0x20] sm:$0xff] (!%p188_p2)  ;;  %v227_v9 = vld [vmem:[%s537_s1 + $0x28] sm:$0xff] (!%p188_p2)  ;;  %vm237_vm1 = vcmask (!%p188_p2), 523264  }
   0x8   : > { %v426_v7 = vpack.c.bf16 (!%p188_p2), %v225_v5, %v224_v2  ;;  %v429_v10 = vpack.c.bf16 (!%p188_p2), %v227_v9, %v226_v8  ;;  %v228_v11 = vld [vmem:[%s537_s1 + $0x30] sm:$0xff] (!%p188_p2)  ;;  %v229_v12 = vld [vmem:[%s537_s1 + $0x38] sm:$0xff] (!%p188_p2)  ;;  %v389_v15 = vld [vmem:[%s538_s2] ss:$0 sm:$0xff] (!%p188_p2)  ;;  %vm320_vm2 = vcmask (!%p188_p2), 261120   ;;  %vm327_vm3 = vcmask (!%p188_p2), 7168  }
   0x9   : > { %424 = vmatpush3.bf16.msra.mxu0 (!%p188_p2), %v423_v4  ;;  %v432_v13 = vpack.c.bf16 (!%p188_p2), %v229_v12, %v228_v11  ;;  %v391_v19 = vld [vmem:[%s539_s3] ss:$0 sm:$0xff] (!%p188_p2) }
   0xa   : > { %425 = vmatprep.subr.bf16.mxu0 (!%p188_p2), %v453_v3 }
   0xd   : > { %427 = vmatpush3.bf16.msra.mxu0 (!%p188_p2), %v426_v7 }
   0xe   : > { %s543_s21 = smov (!%p213_p3, %s382_s21), 1  ;;  %428 = vmatprep.subr.bf16.mxu0 %v453_v3 }
   0xf   : > { %s387_s12 = sshll.u32 %s543_s21, 3  ;;  %s324_s21 = sld [smem:[#allocation2]] }
  0x10   : > { %s216_s15 = scalar_lea.vmem %s536_s0, %s387_s12  ;;  %s220_s4 = scalar_lea.vmem %s541_s5, %s387_s12 }
  0x11   : > { %430 = vmatpush3.bf16.msra.mxu0 %v429_v10  ;;  %v221_v14 = vld [vmem:[%s216_s15] sm:$0xff] }
  0x12   : > { %431 = vmatprep.subr.bf16.mxu0 %v453_v3 }
  0x15   : > { %433 = vmatpush3.bf16.msra.mxu0 %v432_v13  ;;  %v325_v23 = vstv %s324_s21 }
  0x18   : > { %420 = vmatmul.mubr.msk.f32.vlgmr.msra.gmra.mrb[0].mxu0 %vm237_vm1, %v221_v14 }
  0xeb   : > { %v307_v16 = vpop.f32.mrb[0].mxu0 }
  0xec   : > { %v308_v17 = vadd.f32 %v389_v15, %v307_v16  ;;  %v421_v18 = vpop.f32.mrb[1].mxu0 }
  0xee   : > { %v311_v20 = vmax.f32 %v308_v17, 0.0 }
  0xf0   : > { %v319_v21 = vmul.f32 %v391_v19, %v311_v20 }
  0xf2   : > { %v321_v22 = vsel %vm320_vm2, %v319_v21, 0.0 }
  0xf3   : > { %322 = vadd.xlane.f32.xlu0 %v321_v22 }
 0x180   : > { %v323_v24 = vpop.xlane.xlu0 %322 }
 0x181   : > { %v326_v25 = vadd.f32 %v325_v23, %v323_v24 }
 0x183   : > { %328 = vst.msk [vmem:[%s220_s4] sm:$0xff] %vm327_vm3, %v326_v25 }
 0x184 PF: > { %s16_s20 = sadd.s32 1, %s451_s20  }
 0x185   : > { %p13_p4 = scmp.ge.s32.totalorder %s16_s20, 4  }
 0x187   :  { %15 = sbr.rel (!%p13_p4) target bundleno = 2 (0x2), region = 70 }

</bundles_post_ra>
